<compile_context>
chip_gen: v7x
topology: tpu7x:2x2x1
jax: 0.10.0
libtpu: 0.0.40
codegen_flags: <defaults>
</compile_context>

<pallas_src>
import math
import jax
import jax.numpy as jnp
from jax.experimental import pallas as pl
from jax.experimental.pallas import tpu as pltpu


def _round_up(n, m):
    return ((n + m - 1) // m) * m


def _value_fused_kernel(x_ref, w1_ref, b1_ref, w2_ref, b2_ref, wh_ref, bh_ref, o_ref):
    # net layer 1: MXU matmul (K = natural input width), VPU bias add, EUP tanh.
    h = jnp.dot(x_ref[...], w1_ref[...], preferred_element_type=jnp.float32) + b1_ref[...]
    h = jnp.tanh(h)
    # net layer 2
    h = jnp.dot(h, w2_ref[...], preferred_element_type=jnp.float32) + b2_ref[...]
    h = jnp.tanh(h)
    # value head: 1-wide output -> VPU multiply + XLU lane reduction instead of
    # a lane-padded matmul.  bh is a scalar in SMEM.
    v = jnp.sum(h * wh_ref[...], axis=-1, keepdims=True) + bh_ref[0, 0]
    o_ref[...] = v.astype(o_ref.dtype)


def value_forward(x, params, *, block_b=1024):
    """Fused Value forward: value = value_head(tanh(tanh(x@W1+b1)@W2+b2)).

    x: (B, D_in) f32.  Returns (B, 1) f32, matching the PyTorch module.
    Weights (~80 KiB) stay VMEM-resident across the batch grid; only the
    (TB, D_in) x tile and the (TB, 1) output move per grid step.
    """
    (w1, b1), (w2, b2), (wh_row, bh) = params
    B, D_in = x.shape
    H1 = w1.shape[1]
    H2 = w2.shape[1]
    assert w1.shape[0] == D_in and wh_row.shape == (1, H2) and bh.shape == (1, 1)

    # Batch tile: multiple of 8 (sublane), capped so per-tile VMEM stays small
    # on every generation (v5e 16 MiB scoped, v7x 32 MiB scoped / 64 MiB phys).
    TB = min(block_b, _round_up(max(B, 8), 8))
    B_pad = _round_up(B, TB)
    if B_pad != B:
        x = jnp.pad(x, ((0, B_pad - B), (0, 0)))

    out = pl.pallas_call(
        _value_fused_kernel,
        out_shape=jax.ShapeDtypeStruct((B_pad, 1), x.dtype),
        grid=(B_pad // TB,),
        in_specs=[
            pl.BlockSpec((TB, D_in), lambda i: (i, 0)),     # x tile (pipelined)
            pl.BlockSpec((D_in, H1), lambda i: (0, 0)),     # W1 (resident)
            pl.BlockSpec((1, H1), lambda i: (0, 0)),        # b1
            pl.BlockSpec((H1, H2), lambda i: (0, 0)),       # W2
            pl.BlockSpec((1, H2), lambda i: (0, 0)),        # b2
            pl.BlockSpec((1, H2), lambda i: (0, 0)),        # wh row (transposed head weight)
            pl.BlockSpec((1, 1), lambda i: (0, 0),
                         memory_space=pltpu.MemorySpace.SMEM),  # bh scalar
        ],
        out_specs=pl.BlockSpec((TB, 1), lambda i: (i, 0)),
        compiler_params=pltpu.CompilerParams(
            dimension_semantics=("parallel",)),
    )(x, w1, b1, w2, b2, wh_row, bh)

    return out[:B] if B_pad != B else out


def init_value_params(key, input_dim, hidden_dims):
    """Mirrors nn.Linear default init U(-1/sqrt(fan_in), 1/sqrt(fan_in)) for the
    MLP layers, plus Value's head init (weight*0.1, bias*0).  Weights are stored
    (in, out), unpadded; the head weight is stored as a (1, H) row and its bias
    as a (1, 1) scalar."""
    params = []
    last = input_dim
    for nh in hidden_dims:
        key, kw, kb = jax.random.split(key, 3)
        bound = 1.0 / math.sqrt(last)
        w = jax.random.uniform(kw, (last, nh), jnp.float32, -bound, bound)
        b = jax.random.uniform(kb, (1, nh), jnp.float32, -bound, bound)
        params.append((w, b))
        last = nh

    # value_head = nn.Linear(last, 1); weight.data.mul_(0.1); bias.data.mul_(0.0)
    key, kw = jax.random.split(key)
    bound = 1.0 / math.sqrt(last)
    wh_row = (jax.random.uniform(kw, (1, last), jnp.float32, -bound, bound) * 0.1)
    bh = jnp.zeros((1, 1), jnp.float32)
    params.append((wh_row, bh))
    return params


def _reference(x, params):
    (w1, b1), (w2, b2), (wh_row, bh) = params
    h = jnp.tanh(x @ w1 + b1)
    h = jnp.tanh(h @ w2 + b2)
    return h @ wh_row.T + bh


if __name__ == "__main__":
    key = jax.random.PRNGKey(0)
    k_in, k_in2, k_params = jax.random.split(key, 3)

    input_dim = 32
    hidden_dims = (128, 128)
    params = init_value_params(k_params, input_dim, hidden_dims)

    # Small sublane-aligned batch.
    batch = 8
    x = jax.random.normal(k_in, (batch, input_dim), jnp.float32)
    out = jax.block_until_ready(value_forward(x, params))
    assert out.shape == (batch, 1)
    assert jnp.allclose(out, _reference(x, params), atol=1e-5, rtol=1e-5)

    # Non-multiple-of-8 batch exercises the pad/slice remainder path.
    batch2 = 20
    x2 = jax.random.normal(k_in2, (batch2, input_dim), jnp.float32)
    out2 = jax.block_until_ready(value_forward(x2, params))
    assert out2.shape == (batch2, 1)
    assert jnp.allclose(out2, _reference(x2, params), atol=1e-5, rtol=1e-5)

    print("KERNEL_OK")
</pallas_src>

<mosaic_0001>
module attributes {stable_mosaic.version = 11 : i64} {
  func.func @_value_fused_kernel(%arg0: i32, %arg1: memref<8x32xf32, #tpu.memory_space<vmem>>, %arg2: memref<32x128xf32, #tpu.memory_space<vmem>>, %arg3: memref<1x128xf32, #tpu.memory_space<vmem>>, %arg4: memref<128x128xf32, #tpu.memory_space<vmem>>, %arg5: memref<1x128xf32, #tpu.memory_space<vmem>>, %arg6: memref<1x128xf32, #tpu.memory_space<vmem>>, %arg7: memref<1x1xf32, #tpu.memory_space<smem>>, %arg8: memref<8x1xf32, #tpu.memory_space<vmem>>) attributes {dimension_semantics = [#tpu.dimension_semantics<parallel>], iteration_bounds = array<i64: 1>, scalar_prefetch = 0 : i64, scratch_operands = 0 : i64, tpu.core_type = #tpu.core_type<tc>, window_params = [{transform_indices = @transform_0, window_bounds = array<i64: 8, 32>}, {pipeline_mode = #tpu.pipeline_mode<synchronous>, transform_indices = @transform_1, window_bounds = array<i64: 32, 128>}, {pipeline_mode = #tpu.pipeline_mode<synchronous>, transform_indices = @transform_2, window_bounds = array<i64: 1, 128>}, {pipeline_mode = #tpu.pipeline_mode<synchronous>, transform_indices = @transform_3, window_bounds = array<i64: 128, 128>}, {pipeline_mode = #tpu.pipeline_mode<synchronous>, transform_indices = @transform_4, window_bounds = array<i64: 1, 128>}, {pipeline_mode = #tpu.pipeline_mode<synchronous>, transform_indices = @transform_5, window_bounds = array<i64: 1, 128>}, {transform_indices = @transform_6, window_bounds = array<i64: 1, 1>}, {transform_indices = @transform_7, window_bounds = array<i64: 8, 1>}]} {
    %c0 = arith.constant 0 : index
    %c0_0 = arith.constant 0 : index
    %0 = vector.load %arg1[%c0, %c0_0] : memref<8x32xf32, #tpu.memory_space<vmem>>, vector<8x32xf32>
    %c0_1 = arith.constant 0 : index
    %c0_2 = arith.constant 0 : index
    %1 = vector.load %arg2[%c0_1, %c0_2] : memref<32x128xf32, #tpu.memory_space<vmem>>, vector<32x128xf32>
    %cst = arith.constant dense<0.000000e+00> : vector<8x128xf32>
    %2 = tpu.matmul %0, %1, %cst {dimension_numbers = #tpu.dot_dimension_numbers<[1], [0], [0], [1], [0, 0, 1, 1], [], []>} : vector<8x32xf32>, vector<32x128xf32>, vector<8x128xf32> -> vector<8x128xf32>
    %c0_3 = arith.constant 0 : index
    %c0_4 = arith.constant 0 : index
    %3 = vector.load %arg3[%c0_3, %c0_4] : memref<1x128xf32, #tpu.memory_space<vmem>>, vector<1x128xf32>
    %4 = vector.broadcast %3 : vector<1x128xf32> to vector<8x128xf32>
    %5 = arith.addf %2, %4 : vector<8x128xf32>
    %6 = math.tanh %5 : vector<8x128xf32>
    %c0_5 = arith.constant 0 : index
    %c0_6 = arith.constant 0 : index
    %7 = vector.load %arg4[%c0_5, %c0_6] : memref<128x128xf32, #tpu.memory_space<vmem>>, vector<128x128xf32>
    %cst_7 = arith.constant dense<0.000000e+00> : vector<8x128xf32>
    %8 = tpu.matmul %6, %7, %cst_7 {dimension_numbers = #tpu.dot_dimension_numbers<[1], [0], [0], [1], [0, 0, 1, 1], [], []>} : vector<8x128xf32>, vector<128x128xf32>, vector<8x128xf32> -> vector<8x128xf32>
    %c0_8 = arith.constant 0 : index
    %c0_9 = arith.constant 0 : index
    %9 = vector.load %arg5[%c0_8, %c0_9] : memref<1x128xf32, #tpu.memory_space<vmem>>, vector<1x128xf32>
    %10 = vector.broadcast %9 : vector<1x128xf32> to vector<8x128xf32>
    %11 = arith.addf %8, %10 : vector<8x128xf32>
    %12 = math.tanh %11 : vector<8x128xf32>
    %c0_10 = arith.constant 0 : index
    %c0_11 = arith.constant 0 : index
    %13 = vector.load %arg6[%c0_10, %c0_11] : memref<1x128xf32, #tpu.memory_space<vmem>>, vector<1x128xf32>
    %14 = vector.broadcast %13 : vector<1x128xf32> to vector<8x128xf32>
    %15 = arith.mulf %12, %14 : vector<8x128xf32>
    %cst_12 = arith.constant dense<0.000000e+00> : vector<8xf32>
    %16 = vector.multi_reduction <add>, %15, %cst_12 [1] : vector<8x128xf32> to vector<8xf32>
    %17 = vector.shape_cast %16 : vector<8xf32> to vector<8x1xf32>
    %c0_13 = arith.constant 0 : index
    %c0_14 = arith.constant 0 : index
    %18 = memref.load %arg7[%c0_13, %c0_14] : memref<1x1xf32, #tpu.memory_space<smem>>
    %19 = vector.broadcast %18 : f32 to vector<8x1xf32>
    %20 = arith.addf %17, %19 : vector<8x1xf32>
    %c0_15 = arith.constant 0 : index
    %c0_16 = arith.constant 0 : index
    %21 = vector.load %arg8[%c0_15, %c0_16] : memref<8x1xf32, #tpu.memory_space<vmem>>, vector<8x1xf32>
    tpu.vector_store %arg8[%c0_15, %c0_16], %20 {strides = array<i32>} : memref<8x1xf32, #tpu.memory_space<vmem>>, vector<8x1xf32>,
    return
  }
  func.func @transform_0(%arg0: i32) -> (i32, i32) {
    %c0_i32 = arith.constant 0 : i32
    %c0_i32_0 = arith.constant 0 : i32
    return %arg0, %c0_i32 : i32, i32
  }
  func.func @transform_1(%arg0: i32) -> (i32, i32) {
    %c0_i32 = arith.constant 0 : i32
    %c0_i32_0 = arith.constant 0 : i32
    %c0_i32_1 = arith.constant 0 : i32
    return %c0_i32, %c0_i32_0 : i32, i32
  }
  func.func @transform_2(%arg0: i32) -> (i32, i32) {
    %c0_i32 = arith.constant 0 : i32
    %c0_i32_0 = arith.constant 0 : i32
    %c0_i32_1 = arith.constant 0 : i32
    return %c0_i32, %c0_i32_0 : i32, i32
  }
  func.func @transform_3(%arg0: i32) -> (i32, i32) {
    %c0_i32 = arith.constant 0 : i32
    %c0_i32_0 = arith.constant 0 : i32
    %c0_i32_1 = arith.constant 0 : i32
    return %c0_i32, %c0_i32_0 : i32, i32
  }
  func.func @transform_4(%arg0: i32) -> (i32, i32) {
    %c0_i32 = arith.constant 0 : i32
    %c0_i32_0 = arith.constant 0 : i32
    %c0_i32_1 = arith.constant 0 : i32
    return %c0_i32, %c0_i32_0 : i32, i32
  }
  func.func @transform_5(%arg0: i32) -> (i32, i32) {
    %c0_i32 = arith.constant 0 : i32
    %c0_i32_0 = arith.constant 0 : i32
    %c0_i32_1 = arith.constant 0 : i32
    return %c0_i32, %c0_i32_0 : i32, i32
  }
  func.func @transform_6(%arg0: i32) -> (i32, i32) {
    %c0_i32 = arith.constant 0 : i32
    %c0_i32_0 = arith.constant 0 : i32
    %c0_i32_1 = arith.constant 0 : i32
    return %c0_i32, %c0_i32_0 : i32, i32
  }
  func.func @transform_7(%arg0: i32) -> (i32, i32) {
    %c0_i32 = arith.constant 0 : i32
    %c0_i32_0 = arith.constant 0 : i32
    return %arg0, %c0_i32 : i32, i32
  }
}

</mosaic_0001>

<bundles_post_ra>
// kernel: tpu_custom_call.1
= control target key start
LH: loop header
LB: loop body
LE: loop exit
PB: predicated region body
PF: predicated region fallthrough
CT: control target
= control target key end

     0   :  { %13 = vsyncpa [#allocation4], 0  ;;  %s557_s0 = inlined_call_operand.hbm [shape: f32[8,32], index: 0, kind: input, shape index: {}]   ;;  %s558_s1 = inlined_call_operand.hbm [shape: f32[32,128], index: 1, kind: input, shape index: {}]   ;;  %s559_s2 = inlined_call_operand.vmem [shape: f32[1,128], index: 2, kind: input, shape index: {}]   ;;  %s560_s3 = inlined_call_operand.hbm [shape: f32[128,128], index: 3, kind: input, shape index: {}]   ;;  %s561_s4 = inlined_call_operand.vmem [shape: f32[1,128], index: 4, kind: input, shape index: {}]   ;;  %s562_s5 = inlined_call_operand.vmem [shape: f32[1,128], index: 5, kind: input, shape index: {}]   ;;  %s563_s6 = inlined_call_operand.<no memory space> [shape: f32[1,1], index: 6, kind: input, shape index: {}]   ;;  %s564_s7 = inlined_call_operand.vmem [shape: f32[8,1], index: 7, kind: output, shape index: {}]  }
   0x1   :  { %14 = vsyncpa [#allocation6], 0  ;;  %s452_s24 = smov [#allocation5]   ;;  %s382_s28 = scalar_lea.hbm %s558_s1, 512 }
   0x2   :  { %s30_s25 = sshll.u32 %s452_s24, 4  ;;  %p383_p0 = scmp.ne.s32.totalorder %s558_s1, %s382_s28  ;;  %s31_s25 = int_to_ptr.vmem [resolvable:$true] %s30_s25 }
   0x3   :  { %p386_p1 = scmp.lt.u32.totalorder %s382_s28, %s558_s1 }
   0x5   :  { %p388_p2 = pnand %p386_p1, %p383_p0 }
   0x7   :  { %391 = shalt.err (!%p388_p2)
}
   0x8   :  { %s392_s10 = scalar_lea.vmem %s31_s25, 512  ;;  %p397_p4 = scmp.lt.s32.totalorder %s31_s25, %s31_s25 }
   0x9   :  { %p393_p3 = scmp.ne.s32.totalorder %s31_s25, %s392_s10  ;;  %p398_p5 = scmp.lt.s32.totalorder %s392_s10, %s392_s10 }
   0xb   :  { %p399_p6 = por %p398_p5, %p397_p4 }
   0xd   :  { %p400_p7 = pnand %p399_p6, %p393_p3 }
   0xf   :  { %403 = shalt.err (!%p400_p7)
}
  0x10   :  { %s453_s11 = smov 128   ;;  %s454_s12 = smov 8  }
  0x11   :  { %36 = dma.hbm_to_vmem [thread:$0]  %s558_s1, 512, %s31_s25, [#allocation6], %s453_s11, %s453_s11, %s454_s12  }
  0x12   :  { %s455_s15 = smov [#allocation3]   ;;  %s456_s17 = smov [#allocation7]  }
  0x13   :  { %s21_s16 = sshll.u32 %s455_s15, 4  ;;  %s44_s18 = sshll.u32 %s456_s17, 4  ;;  %s22_s16 = int_to_ptr.vmem [resolvable:$true] %s21_s16  ;;  %s45_s18 = int_to_ptr.vmem [resolvable:$true] %s44_s18 }
  0x14   :  { %s404_s21 = scalar_lea.hbm %s557_s0, 128 }
  0x15   :  { %p405_p8 = scmp.ne.s32.totalorder %s557_s0, %s404_s21  ;;  %p408_p9 = scmp.lt.u32.totalorder %s404_s21, %s557_s0 }
  0x17   :  { %p410_p10 = pnand %p408_p9, %p405_p8 }
  0x19   :  { %413 = shalt.err (!%p410_p10)
}
  0x1a   :  { %s414_s1 = scalar_lea.vmem %s22_s16, 128  ;;  %p419_p12 = scmp.lt.s32.totalorder %s22_s16, %s22_s16 }
  0x1b   :  { %p415_p11 = scmp.ne.s32.totalorder %s22_s16, %s414_s1  ;;  %p420_p13 = scmp.lt.s32.totalorder %s414_s1, %s414_s1 }
  0x1d   :  { %p421_p0 = por %p420_p13, %p419_p12 }
  0x1f   :  { %p422_p1 = pnand %p421_p0, %p415_p11 }
  0x21   :  { %425 = shalt.err (!%p422_p1)
}
  0x22   :  { %24 = dma.hbm_to_vmem [thread:$0]  %s557_s0, 128, %s22_s16, [#allocation4]  }
  0x23   :  { %s426_s30 = scalar_lea.hbm %s560_s3, 2048 }
  0x24   :  { %p427_p2 = scmp.ne.s32.totalorder %s560_s3, %s426_s30  ;;  %p430_p3 = scmp.lt.u32.totalorder %s426_s30, %s560_s3 }
  0x26   :  { %p432_p4 = pnand %p430_p3, %p427_p2 }
  0x28   :  { %435 = shalt.err (!%p432_p4)
}
  0x29   :  { %s436_s14 = scalar_lea.vmem %s45_s18, 2048  ;;  %p441_p6 = scmp.lt.s32.totalorder %s45_s18, %s45_s18 }
  0x2a   :  { %p437_p5 = scmp.ne.s32.totalorder %s45_s18, %s436_s14  ;;  %p442_p7 = scmp.lt.s32.totalorder %s436_s14, %s436_s14 }
  0x2c   :  { %p443_p8 = por %p442_p7, %p441_p6 }
  0x2e   :  { %p444_p9 = pnand %p443_p8, %p437_p5 }
  0x30   :  { %447 = shalt.err (!%p444_p9)
}
  0x31   :  { %50 = dma.hbm_to_vmem [thread:$0]  %s560_s3, 2048, %s45_s18, [#allocation6], %s453_s11, %s453_s11, %s454_s12  }
  0x32   :  { %448 = dma.done.wait [#allocation4], 128  }
  0x33   :  { %449 = vsyncadd [#allocation4], 4294967168 }
  0x34   :  { %450 = dma.done.wait [#allocation6], 2560  }
  0x35   :  { %451 = vsyncadd [#allocation6], 4294964736  ;;  %v457_v0 = vmov 0.0|0.0   ;;  %vm458_vm0 = vmmov 0   ;;  %v459_v1 = vmov 0.0   ;;  %v67_v2 = vld [vmem:[#allocation5] sm:$0xff]  ;;  %v258_v45 = vstv %s563_s6 }
  0x36   :  { %340 = vmatprep.subr.bf16.mxu0 %v457_v0  ;;  %302 = vmatprep.mubr.msk.f32.mxu0 %vm458_vm0, %v459_v1  ;;  %v68_v3 = vld [vmem:[#allocation5 + $0x8] sm:$0xff]  ;;  %v69_v4 = vld [vmem:[#allocation5 + $0x10] sm:$0xff]  ;;  %v70_v6 = vld [vmem:[#allocation5 + $0x18] sm:$0xff]  ;;  %vm78_vm1 = vcmask 261120   ;;  %vm260_vm2 = vcmask 7168  }
  0x37   :  { %346 = vmatprep.subr.bf16.mxu1 %v457_v0  ;;  %337 = vmatprep.mubr.msk.f32.mxu1 %vm458_vm0, %v459_v1  ;;  %v341_v5 = vpack.c.bf16 %v68_v3, %v67_v2  ;;  %v153_v7 = vld [vmem:[#allocation7] sm:$0xff]  ;;  %v154_v8 = vld [vmem:[#allocation7 + $0x8] sm:$0xff]  ;;  %v155_v9 = vld [vmem:[#allocation7 + $0x10] sm:$0xff]  ;;  %v344_v11 = vpack.c.bf16 %v70_v6, %v69_v4 }
  0x38   :  { %v156_v10 = vld [vmem:[#allocation7 + $0x18] sm:$0xff]  ;;  %v347_v12 = vpack.c.bf16 %v154_v8, %v153_v7  ;;  %v157_v14 = vld [vmem:[#allocation7 + $0x20] sm:$0xff]  ;;  %v158_v15 = vld [vmem:[#allocation7 + $0x28] sm:$0xff] }
  0x39   :  { %342 = vmatpush3.bf16.msra.mxu0 %v341_v5  ;;  %v350_v13 = vpack.c.bf16 %v156_v10, %v155_v9  ;;  %v66_v16 = vld [vmem:[#allocation3] sm:$0xff]  ;;  %v353_v17 = vpack.c.bf16 %v158_v15, %v157_v14  ;;  %v159_v18 = vld [vmem:[#allocation7 + $0x30] sm:$0xff]  ;;  %v161_v21 = vld [vmem:[#allocation7 + $0x40] sm:$0xff] }
  0x3a   :  { %343 = vmatprep.subr.bf16.mxu0 %v457_v0  ;;  %348 = vmatpush3.bf16.msra.mxu1 %v347_v12  ;;  %v160_v19 = vld [vmem:[#allocation7 + $0x38] sm:$0xff]  ;;  %v162_v22 = vld [vmem:[#allocation7 + $0x48] sm:$0xff]  ;;  %v163_v24 = vld [vmem:[#allocation7 + $0x50] sm:$0xff] }
  0x3b   :  { %349 = vmatprep.subr.bf16.mxu1 %v457_v0  ;;  %v356_v20 = vpack.c.bf16 %v160_v19, %v159_v18  ;;  %v359_v23 = vpack.c.bf16 %v162_v22, %v161_v21  ;;  %v164_v25 = vld [vmem:[#allocation7 + $0x58] sm:$0xff]  ;;  %v165_v27 = vld [vmem:[#allocation7 + $0x60] sm:$0xff]  ;;  %v166_v28 = vld [vmem:[#allocation7 + $0x68] sm:$0xff] }
  0x3c   :  { %v362_v26 = vpack.c.bf16 %v164_v25, %v163_v24  ;;  %v365_v29 = vpack.c.bf16 %v166_v28, %v165_v27  ;;  %v167_v30 = vld [vmem:[#allocation7 + $0x70] sm:$0xff]  ;;  %v168_v31 = vld [vmem:[#allocation7 + $0x78] sm:$0xff] }
  0x3d   :  { %345 = vmatpush3.bf16.msra.mxu0 %v344_v11  ;;  %v368_v32 = vpack.c.bf16 %v168_v31, %v167_v30  ;;  %v268_v33 = vld [vmem:[%s559_s2] ss:$0 sm:$0xff] }
  0x3e   :  { %351 = vmatpush3.bf16.msra.mxu1 %v350_v13  ;;  %v270_v38 = vld [vmem:[%s561_s4] ss:$0 sm:$0xff] }
  0x3f   :  { %352 = vmatprep.subr.bf16.mxu1 %v457_v0  ;;  %v271_v42 = vld [vmem:[%s562_s5] ss:$0 sm:$0xff] }
  0x40   :  { %303 = vmatmul.mubr.msk.f32.vlgmr.msra.gmra.mrb[0].mxu0 %vm78_vm1, %v66_v16 }
  0x42   :  { %354 = vmatpush3.bf16.msra.mxu1 %v353_v17 }
  0x43   :  { %355 = vmatprep.subr.bf16.mxu1 %v457_v0 }
  0x46   :  { %357 = vmatpush3.bf16.msra.mxu1 %v356_v20 }
  0x47   :  { %358 = vmatprep.subr.bf16.mxu1 %v457_v0 }
  0x4a   :  { %360 = vmatpush3.bf16.msra.mxu1 %v359_v23 }
  0x4b   :  { %361 = vmatprep.subr.bf16.mxu1 %v457_v0 }
  0x4e   :  { %363 = vmatpush3.bf16.msra.mxu1 %v362_v26 }
  0x4f   :  { %364 = vmatprep.subr.bf16.mxu1 %v457_v0 }
  0x52   :  { %366 = vmatpush3.bf16.msra.mxu1 %v365_v29 }
  0x53   :  { %367 = vmatprep.subr.bf16.mxu1 %v457_v0 }
  0x56   :  { %369 = vmatpush3.bf16.msra.mxu1 %v368_v32 }
 0x113   :  { %v148_v34 = vpop.f32.mrb[0].mxu0 }
 0x114   :  { %v149_v35 = vadd.f32 %v268_v33, %v148_v34  ;;  %v304_v36 = vpop.f32.mrb[1].mxu0 }
 0x116   :  { %378 = vtanh.f32 %v149_v35 }
 0x120   :  { %v379_v37 = vpop.eup %378 }
 0x121   :  { %338 = vmatmul.mubr.f32.vlgmr.msra.gmra.mrb[0].mxu1 %v379_v37 }
 0x1f4   :  { %v242_v39 = vpop.f32.mrb[0].mxu1 }
 0x1f5   :  { %v243_v40 = vadd.f32 %v270_v38, %v242_v39  ;;  %v339_v41 = vpop.f32.mrb[1].mxu1 }
 0x1f7   :  { %380 = vtanh.f32 %v243_v40 }
 0x201   :  { %v381_v43 = vpop.eup %380 }
 0x202   :  { %v254_v44 = vmul.f32 %v381_v43, %v271_v42 }
 0x204   :  { %255 = vadd.xlane.f32.xlu0 %v254_v44 }
 0x291   :  { %v256_v46 = vpop.xlane.xlu0 %255 }
 0x292   :  { %v259_v47 = vadd.f32 %v258_v45, %v256_v46 }
 0x294   :  { %261 = vst.msk [vmem:[%s564_s7] sm:$0xff] %vm260_vm2, %v259_v47 }
 0x295   :  { %266 = vsyncpa [#allocation4], 1 }
 0x296   :  { %267 = vsyncpa [#allocation6], 1 }

</bundles_post_ra>
